<compile_context>
chip_gen: v5e
topology: v5e:2x2
jax: 0.10.0
libtpu: 0.0.40
codegen_flags: <defaults>
</compile_context>

<pallas_src>
import functools

import jax
import jax.numpy as jnp
from jax.experimental import pallas as pl
from jax.experimental.pallas import tpu as pltpu

LANE = 128
SUBLANE = 8
MAX_BLOCK_ROWS = 4096            # (4096, 128) f32 block = 2 MiB per stream
VMEM_LIMIT_BYTES = 32 * 1024 * 1024


def _round_up(x, m):
    return ((x + m - 1) // m) * m


def _sublane_align(dtype):
    # Native tile second-minor extent: 8 (4-byte), 16 (2-byte), 32 (1-byte).
    return max(SUBLANE, 32 // jnp.dtype(dtype).itemsize)


def _focal_weight(one_minus_pt, gamma):
    # Small integer gammas as repeated multiplies (generic pow costs an extra
    # exp+log pair on the single EUP).
    if float(gamma) == int(gamma) and 0 <= int(gamma) <= 4:
        g = int(gamma)
        if g == 0:
            return jnp.ones_like(one_minus_pt)
        w = one_minus_pt
        for _ in range(g - 1):
            w = w * one_minus_pt
        return w
    return one_minus_pt ** gamma


def _focal_elem(x, t, gamma):
    # Numerically-stable BCE-with-logits (same formulation torch uses):
    #   bce = max(x, 0) - x*t + log1p(exp(-|x|))
    bce = jnp.maximum(x, 0.0) - x * t + jnp.log1p(jnp.exp(-jnp.abs(x)))
    pt = jnp.exp(-bce)
    return _focal_weight(1.0 - pt, gamma) * bce


def _focal_reduce_kernel(x_ref, t_ref, acc_ref, *, gamma, block_rows,
                         blocks_per_p, num_blocks, n_last, mask_tail,
                         has_overhang):
    p = pl.program_id(0)   # parallel axis (megacore split on v7x)
    j = pl.program_id(1)   # reduction axis (arbitrary, last)

    @pl.when(j == 0)
    def _():
        acc_ref[...] = jnp.zeros_like(acc_ref)

    def _accumulate(masked):
        x = x_ref[...].astype(jnp.float32)
        t = t_ref[...].astype(jnp.float32)
        focal = _focal_elem(x, t, gamma)
        if masked:
            # Only the single last real block: zero lane padding and any
            # partial-tile (garbage) rows. Indices are block-local, so they
            # never overflow int32 regardless of total element count.
            row = jax.lax.broadcasted_iota(jnp.int32, (block_rows, LANE), 0)
            lane = jax.lax.broadcasted_iota(jnp.int32, (block_rows, LANE), 1)
            focal = jnp.where(row * LANE + lane < n_last, focal, 0.0)
        # Sublane-aligned partial sums into the resident (8, 128) output block.
        # The (n, 8, 128) reshape matches the f32 vreg tiling, so this lowers
        # to pure VPU adds (no cross-lane reduce, no VMEM round trip).
        acc_ref[...] += focal.reshape(-1, SUBLANE, LANE).sum(axis=0)

    if not (mask_tail or has_overhang):
        _accumulate(False)                      # fast path: every block is full
    else:
        blk = p * blocks_per_p + j
        last_real = num_blocks - 1

        @pl.when(blk < (last_real if mask_tail else num_blocks))
        def _():
            _accumulate(False)

        if mask_tail:
            @pl.when(blk == last_real)
            def _():
                _accumulate(True)
        # blk > last_real (overhang block of the 2-way split): skipped entirely.


def _focal_elemwise_kernel(x_ref, t_ref, o_ref, *, alpha, gamma):
    x = x_ref[...].astype(jnp.float32)
    t = t_ref[...].astype(jnp.float32)
    o_ref[...] = (alpha * _focal_elem(x, t, gamma)).astype(o_ref.dtype)


def focal_loss(inputs, targets, *, alpha=1.0, gamma=1.0, reduction="mean",
               pos_weight=None, max_block_rows=MAX_BLOCK_ROWS):
    """JAX/Pallas equivalent of FocalLoss.forward (pos_weight=None case)."""
    if pos_weight is not None:
        # TODO(synk): pos_weight (per-element BCE weight) not supported here.
        raise NotImplementedError("pos_weight is not supported by this kernel")

    orig_shape = inputs.shape
    x = inputs.reshape(-1)
    t = targets.reshape(-1)
    if t.dtype == jnp.bool_:
        t = t.astype(jnp.int8)       # 1-byte stream; cast to f32 inside kernel
    n = x.shape[0]

    rows = pl.cdiv(n, LANE)
    lane_pad = rows * LANE - n
    if lane_pad:  # pad only to a lane multiple (rare, <= 127 elements)
        x = jnp.pad(x, (0, lane_pad))
        t = jnp.pad(t, (0, lane_pad))
    xp = x.reshape(rows, LANE)
    tp = t.reshape(rows, LANE)

    align = max(_sublane_align(xp.dtype), _sublane_align(tp.dtype))
    block_rows = min(max_block_rows, _round_up(rows, align))
    block_rows = max(align, (block_rows // align) * align)
    num_blocks = pl.cdiv(rows, block_rows)
    # Does the grid's last real block extend past the true element count?
    mask_tail = (num_blocks * block_rows * LANE) != n
    n_last = n - (num_blocks - 1) * block_rows * LANE  # valid elems, last block

    if reduction in ("mean", "sum"):
        # Unconditional 2-way outer parallel axis: shards the mem-bound
        # reduction across both v7x TensorCores (no-op cost on v5e/v6e).
        P = 2 if num_blocks >= 2 else 1
        blocks_per_p = pl.cdiv(num_blocks, P)
        has_overhang = (P * blocks_per_p) != num_blocks

        def in_map(p, j):
            blk = p * blocks_per_p + j
            if has_overhang:
                # Keep the overhang block's DMA in bounds; the kernel skips it.
                blk = jnp.minimum(blk, num_blocks - 1)
            return (blk, 0)

        kernel = functools.partial(
            _focal_reduce_kernel, gamma=float(gamma), block_rows=block_rows,
            blocks_per_p=blocks_per_p, num_blocks=num_blocks, n_last=n_last,
            mask_tail=mask_tail, has_overhang=has_overhang)

        partials = pl.pallas_call(
            kernel,
            out_shape=jax.ShapeDtypeStruct((P * SUBLANE, LANE), jnp.float32),
            grid_spec=pltpu.PrefetchScalarGridSpec(
                num_scalar_prefetch=0,
                grid=(P, blocks_per_p),
                in_specs=[
                    pl.BlockSpec((block_rows, LANE), in_map),
                    pl.BlockSpec((block_rows, LANE), in_map),
                ],
                out_specs=pl.BlockSpec((SUBLANE, LANE), lambda p, j: (p, 0)),
            ),
            compiler_params=pltpu.CompilerParams(
                dimension_semantics=("parallel", "arbitrary"),
                vmem_limit_bytes=VMEM_LIMIT_BYTES),
        )(xp, tp)

        # alpha is a constant scale: apply once to the scalar, not per element.
        total = jnp.float32(alpha) * jnp.sum(partials)
        if reduction == "mean":
            return total / jnp.float32(n)
        return total

    # reduction == 'none': elementwise focal loss, original shape.
    kernel = functools.partial(_focal_elemwise_kernel,
                               alpha=float(alpha), gamma=float(gamma))
    out = pl.pallas_call(
        kernel,
        out_shape=jax.ShapeDtypeStruct((rows, LANE), jnp.float32),
        grid_spec=pltpu.PrefetchScalarGridSpec(
            num_scalar_prefetch=0,
            grid=(num_blocks,),
            in_specs=[
                pl.BlockSpec((block_rows, LANE), lambda i: (i, 0)),
                pl.BlockSpec((block_rows, LANE), lambda i: (i, 0)),
            ],
            out_specs=pl.BlockSpec((block_rows, LANE), lambda i: (i, 0)),
        ),
        compiler_params=pltpu.CompilerParams(
            dimension_semantics=("parallel",),
            vmem_limit_bytes=VMEM_LIMIT_BYTES),
    )(xp, tp)
    out_flat = out.reshape(-1)
    if lane_pad:
        out_flat = out_flat[:n]
    return out_flat.reshape(orig_shape)


def _reference_focal_loss(inputs, targets, alpha, gamma, reduction):
    x = inputs.astype(jnp.float32)
    t = targets.astype(jnp.float32)
    bce = jnp.maximum(x, 0.0) - x * t + jnp.log1p(jnp.exp(-jnp.abs(x)))
    pt = jnp.exp(-bce)
    fl = alpha * (1.0 - pt) ** gamma * bce
    if reduction == "mean":
        return jnp.mean(fl)
    if reduction == "sum":
        return jnp.sum(fl)
    return fl


if __name__ == "__main__":
    key = jax.random.PRNGKey(0)
    k1, k2, k3, k4, k5, k6 = jax.random.split(key, 6)

    # 1) Typical logits map: batch=2, channels=4, 16x16 (lane-aligned, f32).
    inputs = jax.random.normal(k1, (2, 4, 16, 16), dtype=jnp.float32)
    targets = (jax.random.uniform(k2, (2, 4, 16, 16)) > 0.5).astype(jnp.float32)
    for red in ("mean", "sum", "none"):
        got = focal_loss(inputs, targets, alpha=1.0, gamma=1.0, reduction=red)
        jax.block_until_ready(got)
        ref = _reference_focal_loss(inputs, targets, 1.0, 1.0, red)
        assert jnp.allclose(got, ref, rtol=1e-4, atol=1e-5), (red, got, ref)

    # 2) Ragged (non lane-aligned) shape: in-kernel tail mask + gamma=2 fast path.
    inputs2 = jax.random.normal(k3, (3, 5, 7), dtype=jnp.float32)
    targets2 = (jax.random.uniform(k4, (3, 5, 7)) > 0.5).astype(jnp.float32)
    got2 = focal_loss(inputs2, targets2, alpha=0.25, gamma=2.0, reduction="mean")
    jax.block_until_ready(got2)
    ref2 = _reference_focal_loss(inputs2, targets2, 0.25, 2.0, "mean")
    assert jnp.allclose(got2, ref2, rtol=1e-4, atol=1e-6), (got2, ref2)

    # 3) bf16 logits streamed natively (cast to f32 inside the kernel).
    inputs3 = jax.random.normal(k5, (2, 4, 16, 16), dtype=jnp.bfloat16)
    targets3 = (jax.random.uniform(k6, (2, 4, 16, 16)) > 0.5).astype(jnp.float32)
    got3 = focal_loss(inputs3, targets3, alpha=1.0, gamma=2.0, reduction="mean")
    jax.block_until_ready(got3)
    ref3 = _reference_focal_loss(inputs3.astype(jnp.float32), targets3,
                                 1.0, 2.0, "mean")
    assert jnp.allclose(got3, ref3, rtol=1e-4, atol=1e-5), (got3, ref3)

    # 4) Small block size forces a multi-block grid: exercises the 2-way
    #    megacore split with an odd block count (overhang skip), no tail mask.
    inputs4 = jax.random.normal(k1, (3, 4, 16, 16), dtype=jnp.float32)
    targets4 = (jax.random.uniform(k2, (3, 4, 16, 16)) > 0.5).astype(jnp.float32)
    got4 = focal_loss(inputs4, targets4, alpha=1.0, gamma=1.0, reduction="sum",
                      max_block_rows=8)
    jax.block_until_ready(got4)
    ref4 = _reference_focal_loss(inputs4, targets4, 1.0, 1.0, "sum")
    assert jnp.allclose(got4, ref4, rtol=1e-4, atol=1e-3), (got4, ref4)

    # 5) Ragged + odd block count: masked last block, overhang skip, and the
    #    elementwise path with a partial boundary tile.
    inputs5 = jax.random.normal(k3, (2359,), dtype=jnp.float32)
    targets5 = (jax.random.uniform(k4, (2359,)) > 0.5).astype(jnp.float32)
    for red in ("mean", "none"):
        got5 = focal_loss(inputs5, targets5, alpha=0.5, gamma=2.0,
                          reduction=red, max_block_rows=8)
        jax.block_until_ready(got5)
        ref5 = _reference_focal_loss(inputs5, targets5, 0.5, 2.0, red)
        assert jnp.allclose(got5, ref5, rtol=1e-4, atol=1e-5), (red,)

    print("KERNEL_OK")
</pallas_src>

<mosaic_0001>
module attributes {stable_mosaic.version = 11 : i64} {
  func.func @_focal_reduce_kernel(%arg0: i32, %arg1: i32, %arg2: memref<16x128xf32, #tpu.memory_space<vmem>>, %arg3: memref<16x128xf32, #tpu.memory_space<vmem>>, %arg4: memref<8x128xf32, #tpu.memory_space<vmem>>) attributes {dimension_semantics = [#tpu.dimension_semantics<parallel>, #tpu.dimension_semantics<arbitrary>], iteration_bounds = array<i64: 1, 1>, scalar_prefetch = 0 : i64, scratch_operands = 0 : i64, tpu.core_type = #tpu.core_type<tc>, window_params = [{transform_indices = @transform_0, window_bounds = array<i64: 16, 128>}, {transform_indices = @transform_1, window_bounds = array<i64: 16, 128>}, {transform_indices = @transform_2, window_bounds = array<i64: 8, 128>}]} {
    %c0_i32 = arith.constant 0 : i32
    %0 = arith.cmpi eq, %arg1, %c0_i32 : i32
    %1 = arith.extui %0 : i1 to i32
    %c0_i32_0 = arith.constant 0 : i32
    %2 = arith.cmpi ne, %1, %c0_i32_0 : i32
    scf.if %2 {
      %cst_12 = arith.constant 0.000000e+00 : f32
      %26 = vector.broadcast %cst_12 : f32 to vector<8x128xf32>
      %c0_13 = arith.constant 0 : index
      %c0_14 = arith.constant 0 : index
      %27 = vector.load %arg4[%c0_13, %c0_14] : memref<8x128xf32, #tpu.memory_space<vmem>>, vector<8x128xf32>
      tpu.vector_store %arg4[%c0_13, %c0_14], %26 {strides = array<i32>} : memref<8x128xf32, #tpu.memory_space<vmem>>, vector<8x128xf32>,
    } else {
    }
    %c0 = arith.constant 0 : index
    %c0_1 = arith.constant 0 : index
    %3 = vector.load %arg2[%c0, %c0_1] : memref<16x128xf32, #tpu.memory_space<vmem>>, vector<16x128xf32>
    %c0_2 = arith.constant 0 : index
    %c0_3 = arith.constant 0 : index
    %4 = vector.load %arg3[%c0_2, %c0_3] : memref<16x128xf32, #tpu.memory_space<vmem>>, vector<16x128xf32>
    %cst = arith.constant 0.000000e+00 : f32
    %5 = vector.broadcast %cst : f32 to vector<16x128xf32>
    %6 = arith.maximumf %3, %5 : vector<16x128xf32>
    %7 = arith.mulf %3, %4 : vector<16x128xf32>
    %8 = arith.subf %6, %7 : vector<16x128xf32>
    %9 = math.absf %3 : vector<16x128xf32>
    %cst_4 = arith.constant 0.000000e+00 : f32
    %10 = vector.broadcast %cst_4 : f32 to vector<16x128xf32>
    %11 = arith.subf %10, %9 : vector<16x128xf32>
    %12 = math.exp %11 : vector<16x128xf32>
    %13 = math.log1p %12 : vector<16x128xf32>
    %14 = arith.addf %8, %13 : vector<16x128xf32>
    %cst_5 = arith.constant 0.000000e+00 : f32
    %15 = vector.broadcast %cst_5 : f32 to vector<16x128xf32>
    %16 = arith.subf %15, %14 : vector<16x128xf32>
    %17 = math.exp %16 : vector<16x128xf32>
    %cst_6 = arith.constant 1.000000e+00 : f32
    %18 = vector.broadcast %cst_6 : f32 to vector<16x128xf32>
    %19 = arith.subf %18, %17 : vector<16x128xf32>
    %20 = arith.mulf %19, %14 : vector<16x128xf32>
    %c0_7 = arith.constant 0 : index
    %c0_8 = arith.constant 0 : index
    %21 = vector.load %arg4[%c0_7, %c0_8] : memref<8x128xf32, #tpu.memory_space<vmem>>, vector<8x128xf32>
    %22 = vector.shape_cast %20 : vector<16x128xf32> to vector<2x8x128xf32>
    %cst_9 = arith.constant dense<0.000000e+00> : vector<8x128xf32>
    %23 = vector.multi_reduction <add>, %22, %cst_9 [0] : vector<2x8x128xf32> to vector<8x128xf32>
    %24 = arith.addf %21, %23 : vector<8x128xf32>
    %c0_10 = arith.constant 0 : index
    %c0_11 = arith.constant 0 : index
    %25 = vector.load %arg4[%c0_10, %c0_11] : memref<8x128xf32, #tpu.memory_space<vmem>>, vector<8x128xf32>
    tpu.vector_store %arg4[%c0_10, %c0_11], %24 {strides = array<i32>} : memref<8x128xf32, #tpu.memory_space<vmem>>, vector<8x128xf32>,
    return
  }
  func.func @transform_0(%arg0: i32, %arg1: i32) -> (i32, i32) {
    %c1_i32 = arith.constant 1 : i32
    %0 = arith.muli %arg0, %c1_i32 : i32
    %1 = arith.addi %0, %arg1 : i32
    %c0_i32 = arith.constant 0 : i32
    %c0_i32_0 = arith.constant 0 : i32
    return %1, %c0_i32 : i32, i32
  }
  func.func @transform_1(%arg0: i32, %arg1: i32) -> (i32, i32) {
    %c1_i32 = arith.constant 1 : i32
    %0 = arith.muli %arg0, %c1_i32 : i32
    %1 = arith.addi %0, %arg1 : i32
    %c0_i32 = arith.constant 0 : i32
    %c0_i32_0 = arith.constant 0 : i32
    return %1, %c0_i32 : i32, i32
  }
  func.func @transform_2(%arg0: i32, %arg1: i32) -> (i32, i32) {
    %c0_i32 = arith.constant 0 : i32
    %c0_i32_0 = arith.constant 0 : i32
    return %arg0, %c0_i32 : i32, i32
  }
}

</mosaic_0001>

<bundles_post_ra>
// kernel: tpu_custom_call.1
= control target key start
LH: loop header
LB: loop body
LE: loop exit
PB: predicated region body
PF: predicated region fallthrough
CT: control target
= control target key end

     0   :  { %7 = vsyncpa [#allocation3], 0  ;;  %s256_s0 = inlined_call_operand.hbm [shape: f32[16,128], index: 0, kind: input, shape index: {}]   ;;  %s257_s1 = inlined_call_operand.hbm [shape: f32[16,128], index: 1, kind: input, shape index: {}]   ;;  %s258_s2 = inlined_call_operand.hbm [shape: f32[8,128], index: 2, kind: output, shape index: {}]  }
   0x1   :  { %8 = vsyncpa [#allocation6], 0 }
   0x2   :  { %9 = vsyncpa [#allocation4], 0  ;;  %s18_s11 = sshll.u32 %s256_s0, 4  ;;  %s227_s12 = smov [#allocation2]   ;;  %s19_s11 = int_to_ptr.hbm [resolvable:$true] %s18_s11 }
   0x3   :  { %s20_s13 = sshll.u32 %s227_s12, 4  ;;  %s35_s16 = sshll.u32 %s257_s1, 4  ;;  %s21_s13 = int_to_ptr.vmem [resolvable:$true] %s20_s13  ;;  %s36_s16 = int_to_ptr.hbm [resolvable:$true] %s35_s16 }
   0x4   :  { %s228_s17 = smov 128   ;;  %s229_s18 = smov 8  }
   0x5   :  { %26 = dma.hbm_to_vmem [thread:$0]  %s19_s11, 256, %s21_s13, [#allocation3], %s228_s17, %s228_s17, %s229_s18  }
   0x6   :  { %s230_s19 = smov [#allocation5]  }
   0x7   :  { %s37_s20 = sshll.u32 %s230_s19, 4  ;;  %s38_s20 = int_to_ptr.vmem [resolvable:$true] %s37_s20 }
   0x8   :  { %43 = dma.hbm_to_vmem [thread:$0]  %s36_s16, 256, %s38_s20, [#allocation6], %s228_s17, %s228_s17, %s229_s18  }
   0x9   :  { %221 = dma.done.wait [#allocation3], 256  }
   0xa   :  { %222 = vsyncadd [#allocation3], 4294967040 }
   0xb   :  { %223 = dma.done.wait [#allocation6], 256  }
   0xc   :  { %224 = vsyncadd [#allocation6], 4294967040  ;;  %v61_v0 = vld [vmem:[#allocation2] sm:$0xff]  ;;  %v62_v1 = vld [vmem:[#allocation2 + $0x8] sm:$0xff]  ;;  %s231_s0 = smov [#allocation7]   ;;  %s120_s23 = sshll.u32 %s258_s2, 4  ;;  %s121_s23 = int_to_ptr.hbm [resolvable:$true] %s120_s23 }
   0xd   :  { %v71_v2 = vand.u32 2147483647, %v61_v0  ;;  %v72_v3 = vand.u32 2147483647, %v62_v1  ;;  %v63_v12 = vld [vmem:[#allocation5] sm:$0xff]  ;;  %v64_v15 = vld [vmem:[#allocation5 + $0x8] sm:$0xff] }
   0xe   :  { %v65_v17 = vmax.f32 %v61_v0, 0.0  ;;  %v67_v18 = vmul.f32 %v63_v12, %v61_v0  ;;  %v66_v21 = vmax.f32 %v62_v1, 0.0  ;;  %v68_v22 = vmul.f32 %v64_v15, %v62_v1  ;;  %s118_s1 = sshll.u32 %s231_s0, 4  ;;  %s119_s1 = int_to_ptr.vmem [resolvable:$true] %s118_s1 }
   0xf   :  { %v73_v4 = vsub.f32 0.0, %v71_v2  ;;  %v74_v5 = vsub.f32 0.0, %v72_v3 }
  0x10   :  { %v69_v26 = vsub.f32 %v65_v17, %v67_v18  ;;  %v70_v29 = vsub.f32 %v66_v21, %v68_v22 }
  0x11   :  { %v75_v6 = vmul.f32 1.442695, %v73_v4  ;;  %v77_v7 = vmul.f32 1.442695, %v74_v5 }
  0x13   :  { %137 = vpow2.f32 %v75_v6 }
  0x14   :  { %139 = vpow2.f32 %v77_v7 }
  0x19   :  { %v138_v8 = vpop.eup %137 }
  0x1a   :  { %v140_v9 = vpop.eup %139  ;;  %v79_v10 = vadd.f32 1.0, %v138_v8  ;;  %v82_v11 = vmul.f32 -0.5, %v138_v8  ;;  %v85_v19 = vand.u32 2147483647, %v138_v8 }
  0x1b   :  { %v88_v13 = vadd.f32 1.0, %v140_v9  ;;  %v91_v14 = vmul.f32 -0.5, %v140_v9  ;;  %v94_v23 = vand.u32 2147483647, %v140_v9 }
  0x1c   :  { %141 = vlog2.f32 %v79_v10  ;;  %v83_v16 = vadd.f32 1.0, %v82_v11  ;;  %vm86_vm0 = vcmp.lt.f32.partialorder %v85_v19, 0.0004427343 }
  0x1d   :  { %143 = vlog2.f32 %v88_v13  ;;  %v92_v20 = vadd.f32 1.0, %v91_v14  ;;  %vm95_vm1 = vcmp.lt.f32.partialorder %v94_v23, 0.0004427343 }
  0x1e   :  { %v84_v24 = vmul.f32 %v138_v8, %v83_v16 }
  0x1f   :  { %v93_v27 = vmul.f32 %v140_v9, %v92_v20 }
  0x22   :  { %v142_v25 = vpop.eup %141 }
  0x23   :  { %v144_v28 = vpop.eup %143  ;;  %v81_v30 = vmul.f32 0.6931472, %v142_v25 }
  0x24   :  { %v90_v31 = vmul.f32 0.6931472, %v144_v28 }
  0x25   :  { %v87_v32 = vsel %vm86_vm0, %v84_v24, %v81_v30 }
  0x26   :  { %v96_v33 = vsel %vm95_vm1, %v93_v27, %v90_v31  ;;  %v97_v34 = vadd.f32 %v87_v32, %v69_v26 }
  0x27   :  { %v98_v35 = vadd.f32 %v96_v33, %v70_v29 }
  0x28   :  { %v99_v36 = vsub.f32 0.0, %v97_v34 }
  0x29   :  { %v100_v37 = vsub.f32 0.0, %v98_v35 }
  0x2a   :  { %v101_v38 = vmul.f32 1.442695, %v99_v36 }
  0x2b   :  { %v103_v39 = vmul.f32 1.442695, %v100_v37 }
  0x2c   :  { %145 = vpow2.f32 %v101_v38 }
  0x2d   :  { %147 = vpow2.f32 %v103_v39 }
  0x32   :  { %v146_v40 = vpop.eup %145 }
  0x33   :  { %v148_v41 = vpop.eup %147  ;;  %v105_v42 = vsub.f32 1.0, %v146_v40 }
  0x34   :  { %v106_v43 = vsub.f32 1.0, %v148_v41 }
  0x35   :  { %v107_v44 = vmul.f32 %v105_v42, %v97_v34 }
  0x36   :  { %v108_v45 = vmul.f32 %v106_v43, %v98_v35 }
  0x38   :  { %v110_v46 = vadd.f32 %v108_v45, %v107_v44 }
  0x3a   :  { %112 = vst [vmem:[#allocation7] sm:$0xff] %v110_v46 }
  0x3b   :  { %123 = dma.vmem_to_hbm [thread:$0]  %s119_s1, 128, %s121_s23, [#allocation4]  }
  0x3c   :  { %225 = dma.done.wait [#allocation4], 128  }
  0x3d   :  { %226 = vsyncadd [#allocation4], 4294967168 }
  0x3e   :  { %128 = vsyncpa [#allocation3], 1 }
  0x3f   :  { %129 = vsyncpa [#allocation6], 1 }
  0x40   :  { %130 = vsyncpa [#allocation4], 1 }

</bundles_post_ra>
